<compile_context>
chip_gen: v7x
topology: tpu7x:2x2x1
jax: 0.10.0
libtpu: 0.0.40
codegen_flags: <defaults>
</compile_context>

<pallas_src>
import math

import jax
import jax.numpy as jnp
from jax.experimental import pallas as pl
from jax.experimental.pallas import tpu as pltpu

_LANE = 128


def _drop_path_kernel(scale_ref, x_ref, o_ref):
    # scale_ref: (1, 1) per-sample scale (0 or 1/keep_prob), already in x's dtype.
    # x_ref / o_ref: (tR, 128) lane-dense tiles of sample b (batch dim squeezed).
    o_ref[...] = (x_ref[...] * scale_ref[...]).astype(o_ref.dtype)


def _sublane_multiple(dtype) -> int:
    # Native tile granularity along the sublane axis: 8 rows for 4-byte dtypes,
    # 16 for 2-byte (bf16/f16), 32 for 1-byte (int8/fp8).
    itemsize = jnp.dtype(dtype).itemsize
    return max(8, 32 // max(itemsize, 1))


def drop_path_forward(x, seed, drop_prob: float, training: bool = True, *,
                      row_tile: int = 2048, min_kernel_elems: int = 1 << 17,
                      donate_x: bool = False):
    """Pallas TPU DropPath forward. x: (B, ...), seed: int or jax PRNG key."""
    if drop_prob == 0.0 or not training:
        return x                                   # identity path, exactly like PyTorch
    if not (0.0 < drop_prob < 1.0):
        raise ValueError(f"drop_prob must be in [0, 1), got {drop_prob}")
    keep_prob = 1.0 - float(drop_prob)

    B = x.shape[0]

    # Per-sample Bernoulli(keep_prob) scale, computed once in the wrapper (B floats).
    # floor(keep_prob + U[0,1)) matches the PyTorch construction exactly.
    key = jax.random.PRNGKey(seed) if isinstance(seed, int) else seed
    u = jax.random.uniform(key, (B,), dtype=jnp.float32)
    keep = jnp.floor(jnp.float32(keep_prob) + u)
    scale = (keep * jnp.float32(1.0 / keep_prob)).astype(x.dtype)   # 0 or 1/keep_prob

    # Small-input fast path: a single fused XLA multiply beats kernel launch +
    # layout plumbing for tiny activations.
    if x.size < min_kernel_elems:
        return x * scale.reshape((B,) + (1,) * (x.ndim - 1))

    orig_shape = x.shape
    M = math.prod(x.shape[1:])

    # Lane-dense layout: (B, M) -> (B, R, 128).  Pad only the lane tail; the row
    # dimension is never padded (full-extent or partial last block instead).
    M_pad = pl.cdiv(M, _LANE) * _LANE
    x2 = x.reshape(B, M)
    if M_pad != M:
        x2 = jnp.pad(x2, ((0, 0), (0, M_pad - M)))
    R = M_pad // _LANE
    x3 = x2.reshape(B, R, _LANE)

    sub = _sublane_multiple(x.dtype)
    if R <= row_tile:
        tR = R                                     # full-extent row block: always legal
    else:
        tR = max(sub, (int(row_tile) // sub) * sub)
    grid = (B, pl.cdiv(R, tR))

    scale3 = scale.reshape(B, 1, 1)

    itemsize = jnp.dtype(x.dtype).itemsize
    cost = pl.CostEstimate(
        flops=B * R * _LANE,                       # one mul per element
        transcendentals=0,
        bytes_accessed=2 * B * R * _LANE * itemsize,   # read x + write y
    )

    out = pl.pallas_call(
        _drop_path_kernel,
        out_shape=jax.ShapeDtypeStruct((B, R, _LANE), x.dtype),
        grid=grid,
        in_specs=[
            pl.BlockSpec((None, 1, 1), lambda b, r: (b, 0, 0)),       # per-sample scale
            pl.BlockSpec((None, tR, _LANE), lambda b, r: (b, r, 0)),  # x tile
        ],
        out_specs=pl.BlockSpec((None, tR, _LANE), lambda b, r: (b, r, 0)),
        compiler_params=pltpu.CompilerParams(
            dimension_semantics=("parallel", "parallel")),
        cost_estimate=cost,
        input_output_aliases=({1: 0} if donate_x else {}),
    )(scale3, x3)

    y = out.reshape(B, M_pad)
    if M_pad != M:
        y = y[:, :M]
    return y.reshape(orig_shape)


if __name__ == "__main__":
    key = jax.random.PRNGKey(0)
    kx1, kx2 = jax.random.split(key)

    drop_prob = 0.5
    keep_prob = 1.0 - drop_prob
    seed = 1234

    # primary case: (B, C, H, W) = (2, 4, 16, 16); force the Pallas kernel path
    x = jax.random.normal(kx1, (2, 4, 16, 16), jnp.float32)
    y = jax.block_until_ready(
        drop_path_forward(x, seed, drop_prob, training=True, min_kernel_elems=0))
    assert y.shape == x.shape and y.dtype == x.dtype

    # structural check: each sample is either dropped (all zeros) or kept & rescaled
    for b in range(x.shape[0]):
        kept = bool(jnp.allclose(y[b], x[b] / keep_prob, atol=1e-5, rtol=1e-5))
        dropped = bool(jnp.allclose(y[b], 0.0, atol=1e-6))
        assert kept or dropped, f"sample {b}: not a valid drop-path output"

    # determinism: same seed -> identical mask/output
    y2 = jax.block_until_ready(
        drop_path_forward(x, seed, drop_prob, training=True, min_kernel_elems=0))
    assert bool(jnp.allclose(y, y2))

    # fast path (default threshold skips the kernel) agrees with the kernel path
    y_fast = drop_path_forward(x, seed, drop_prob, training=True)
    assert bool(jnp.allclose(y, y_fast))

    # identity paths (p == 0 or eval mode) match PyTorch exactly
    assert bool(jnp.allclose(drop_path_forward(x, seed, 0.0, training=True), x))
    assert bool(jnp.allclose(drop_path_forward(x, seed, drop_prob, training=False), x))

    # ragged shape exercises the lane-pad path through the kernel
    xr = jax.random.normal(kx2, (2, 3, 5, 7), jnp.float32)
    yr = jax.block_until_ready(
        drop_path_forward(xr, seed + 1, drop_prob, training=True, min_kernel_elems=0))
    for b in range(xr.shape[0]):
        kept = bool(jnp.allclose(yr[b], xr[b] / keep_prob, atol=1e-5, rtol=1e-5))
        dropped = bool(jnp.allclose(yr[b], 0.0, atol=1e-6))
        assert kept or dropped, f"ragged sample {b}: not a valid drop-path output"

    print("KERNEL_OK")
</pallas_src>

<mosaic_0001>
module attributes {stable_mosaic.version = 11 : i64} {
  func.func @_drop_path_kernel(%arg0: i32, %arg1: i32, %arg2: memref<1x1x1xf32, #tpu.memory_space<vmem>>, %arg3: memref<1x8x128xf32, #tpu.memory_space<vmem>>, %arg4: memref<1x8x128xf32, #tpu.memory_space<vmem>>) attributes {dimension_semantics = [#tpu.dimension_semantics<parallel>, #tpu.dimension_semantics<parallel>], iteration_bounds = array<i64: 2, 1>, scalar_prefetch = 0 : i64, scratch_operands = 0 : i64, tpu.core_type = #tpu.core_type<tc>, window_params = [{transform_indices = @transform_0, window_bounds = array<i64: 1, 1, 1>}, {transform_indices = @transform_1, window_bounds = array<i64: 1, 8, 128>}, {transform_indices = @transform_2, window_bounds = array<i64: 1, 8, 128>}]} {
    %c0 = arith.constant 0 : index
    %c0_0 = arith.constant 0 : index
    %c0_1 = arith.constant 0 : index
    %0 = vector.load %arg3[%c0, %c0_0, %c0_1] : memref<1x8x128xf32, #tpu.memory_space<vmem>>, vector<1x8x128xf32>
    %1 = vector.shape_cast %0 : vector<1x8x128xf32> to vector<8x128xf32>
    %c0_2 = arith.constant 0 : index
    %c0_3 = arith.constant 0 : index
    %c0_4 = arith.constant 0 : index
    %2 = vector.load %arg2[%c0_2, %c0_3, %c0_4] : memref<1x1x1xf32, #tpu.memory_space<vmem>>, vector<1x1x1xf32>
    %3 = vector.shape_cast %2 : vector<1x1x1xf32> to vector<1x1xf32>
    %4 = vector.broadcast %3 : vector<1x1xf32> to vector<8x128xf32>
    %5 = arith.mulf %1, %4 : vector<8x128xf32>
    %c0_5 = arith.constant 0 : index
    %c0_6 = arith.constant 0 : index
    %c0_7 = arith.constant 0 : index
    %6 = vector.load %arg4[%c0_5, %c0_6, %c0_7] : memref<1x8x128xf32, #tpu.memory_space<vmem>>, vector<1x8x128xf32>
    %7 = vector.shape_cast %6 : vector<1x8x128xf32> to vector<8x128xf32>
    %8 = vector.shape_cast %5 : vector<8x128xf32> to vector<1x8x128xf32>
    tpu.vector_store %arg4[%c0_5, %c0_6, %c0_7], %8 {strides = array<i32>} : memref<1x8x128xf32, #tpu.memory_space<vmem>>, vector<1x8x128xf32>,
    return
  }
  func.func @transform_0(%arg0: i32, %arg1: i32) -> (i32, i32, i32) {
    %c0_i32 = arith.constant 0 : i32
    %c0_i32_0 = arith.constant 0 : i32
    %c0_i32_1 = arith.constant 0 : i32
    return %arg0, %c0_i32, %c0_i32_0 : i32, i32, i32
  }
  func.func @transform_1(%arg0: i32, %arg1: i32) -> (i32, i32, i32) {
    %c0_i32 = arith.constant 0 : i32
    %c0_i32_0 = arith.constant 0 : i32
    return %arg0, %arg1, %c0_i32 : i32, i32, i32
  }
  func.func @transform_2(%arg0: i32, %arg1: i32) -> (i32, i32, i32) {
    %c0_i32 = arith.constant 0 : i32
    %c0_i32_0 = arith.constant 0 : i32
    return %arg0, %arg1, %c0_i32 : i32, i32, i32
  }
}

</mosaic_0001>

<bundles_post_ra>
// kernel: tpu_custom_call.1
= control target key start
LH: loop header
LB: loop body
LE: loop exit
PB: predicated region body
PF: predicated region fallthrough
CT: control target
= control target key end

     0   :  { %7 = vsyncpa [#allocation3], 0  ;;  %s694_s0 = inlined_call_operand.vmem [shape: f32[2,1,1], index: 0, kind: input, shape index: {}]   ;;  %s695_s1 = inlined_call_operand.hbm [shape: f32[2,8,128], index: 1, kind: input, shape index: {}]   ;;  %s696_s2 = inlined_call_operand.hbm [shape: f32[2,8,128], index: 2, kind: output, shape index: {}]  }
   0x1   :  { %9 = vsyncpa [#allocation3 + $0x1], 0 }
   0x2   :  { %10 = vsyncpa [#allocation4], 0 }
   0x3   :  { %12 = vsyncpa [#allocation4 + $0x1], 0  ;;  %s517_s9 = smov 0   ;;  %s519_s10 = smov 0  }
   0x4   :  { %s521_s11 = smov 0   ;;  %s523_s12 = smov 0  }
   0x5   :  { %s525_s13 = smov 0   ;;  %s527_s14 = smov 0  }
   0x6 LB: > { %s307_s15 = sadd.s32 4294967295, %s497_s14   ;;  %s308_s16 = sadd.s32 4294967294, %s497_s14   ;;  %s497_s14 = sphi %s527_s14, %s18_s14   ;;  %s493_s13 = sphi %s525_s13, %s712_s13   ;;  %s489_s12 = sphi %s523_s12, %s711_s12   ;;  %s485_s11 = sphi %s521_s11, %s710_s11   ;;  %s481_s10 = sphi %s519_s10, %s709_s10   ;;  %s477_s9 = sphi %s517_s9, %s708_s9  }
   0x7   : > { %s30_s17 = sadd.s32 1, %s493_s13  ;;  %s65_s18 = sadd.s32 1, %s485_s11 }
   0x8   : > { %p32_p0 = scmp.ge.s32.totalorder %s30_s17, 2  ;;  %p72_p1 = scmp.ne.s32.totalorder %s485_s11, %s481_s10 }
   0x9   : > { %p73_p2 = scmp.eq.s32.totalorder %s497_s14, 0  ;;  %p78_p3 = scmp.ne.s32.totalorder %s481_s10, %s477_s9 }
   0xa   : > { %s714_s17 = smov (%p32_p0, %s30_s17), 0  ;;  %p79_p5 = scmp.eq.s32.totalorder %s307_s15, 0 }
   0xb   : > { %p558_p4 = por %p73_p2, %p72_p1  ;;  %s60_s20 = ssub.s32 %s493_s13, %s714_s17 }
   0xc   : > { %p104_p6 = scmp.eq.s32.totalorder %s307_s15, 1  ;;  %p63_p7 = scmp.eq.s32.totalorder %s60_s20, 0 }
   0xd   : > { %p564_p8 = por %p79_p5, %p78_p3  ;;  %p110_p10 = scmp.eq.s32.totalorder %s308_s16, 1 }
   0xe   : > { %p568_p9 = por %p104_p6, %p72_p1  ;;  %p333_p13 = scmp.lt.s32.totalorder %s497_s14, 2 }
   0xf   : > { %s573_s23 = scalar_select %p63_p7, %s485_s11, %s65_s18  }
  0x10   : > { %s700_s22 = scalar_select %p568_p9, 1, 0 }
  0x11   : > { %p575_p11 = por %p110_p10, %p78_p3  ;;  %s136_s25 = sand.u32 1, %s485_s11  }
  0x12   : > { %s311_s26 = sshll.u32 %s136_s25, 3  ;;  %s312_s27 = sshll.u32 %s493_s13, 7 }
  0x13   : > { %s701_s24 = scalar_select %p575_p11, 1, 0 }
  0x14   : > { %s586_s30 = scalar_lea.hbm %s695_s1, %s312_s27  ;;  %s140_s3 = scalar_lea.vmem [#allocation2], %s311_s26 }
  0x15   : > { %s148_s4 = sshll.u32 %s140_s3, 4  ;;  %p592_p0 = pnand %p333_p13, %p558_p4  ;;  %s588_s4 = int_to_ptr.vmem [resolvable:$true] %s148_s4 }
  0x16   : > { %s137_s6 = scalar_lea.sflag [#allocation3], %s136_s25  ;;  %s385_s7 = scalar_lea.hbm %s586_s30, 128 }
  0x17   : > { %p386_p3 = scmp.ne.s32.totalorder %s586_s30, %s385_s7  ;;  %p387_p5 = pneg %p592_p0 }
  0x18   : > { %s390_s16 = scalar_lea.hbm %s695_s1, 256  ;;  %p391_p4 = scmp.lt.u32.totalorder %s586_s30, %s695_s1 }
  0x19   : > { %p388_p6 = pnand %p387_p5, %p386_p3  ;;  %p392_p10 = scmp.lt.u32.totalorder %s390_s16, %s385_s7 }
  0x1a   : > { %p394_p12 = scmp.lt.u32.totalorder %s385_s7, %s586_s30 }
  0x1b   : > { %p389_p7 = pneg %p388_p6  ;;  %p393_p13 = por %p392_p10, %p391_p4 }
  0x1d   : > { %p395_p1 = por %p394_p12, %p393_p13 }
  0x1f   : > { %p396_p2 = pnand %p395_p1, %p389_p7 }
  0x21   : > { %399 = shalt.err (!%p396_p2)
}
  0x22   : > { %s400_s20 = scalar_lea.vmem %s588_s4, 128  ;;  %s499_s25 = smov [#allocation2]  }
  0x23   : > { %p401_p3 = scmp.ne.s32.totalorder %s588_s4, %s400_s20  ;;  %s405_s26 = sshll.u32 %s499_s25, 4  ;;  %s406_s26 = int_to_ptr.vmem [resolvable:$false] %s405_s26 }
  0x24   : > { %s407_s27 = scalar_lea.vmem %s406_s26, 256  ;;  %p408_p9 = scmp.lt.s32.totalorder %s588_s4, %s406_s26 }
  0x25   : > { %p403_p6 = pnand %p401_p3, %p387_p5  ;;  %p409_p4 = scmp.lt.s32.totalorder %s407_s27, %s400_s20 }
  0x27   : > { %p404_p11 = pneg %p403_p6  ;;  %p410_p10 = por %p409_p4, %p408_p9 }
  0x29   : > { %p411_p12 = pnand %p410_p10, %p404_p11 }
  0x2b   : > { %414 = shalt.err (!%p411_p12)
}
  0x2c   : > { %328 = dma.hbm_to_vmem [thread:$0]  (!%p592_p0), %s586_s30, 128, %s588_s4, %s137_s6  }
  0x2d   : > { %p703_p1 = scmp.lt.s32.totalorder %s497_s14, 3  ;;  %p704_p2 = scmp.ge.s32.totalorder %s497_s14, 1 }
  0x2f   : > { %p154_p5 = pnand %p704_p2, %p703_p1 }
  0x30   : > { %s628_s28 = sand.u32 (!%p154_p5), 1, %s481_s10  }
  0x31   : > { %157 = sbr.rel (%p154_p5) target bundleno = 207 (0xcf), region = 28  ;;  %s314_s29 = sshll.u32 (!%p154_p5), %s628_s28, 3 }
  0x32   : > { %s160_s3 = scalar_lea.sflag (!%p154_p5), [#allocation3], %s628_s28  ;;  %s163_s7 = scalar_lea.vmem (!%p154_p5), [#allocation2], %s314_s29 }
  0x38   : > { %468 = dma.done.wait (%p564_p8), %s160_s3, 128  }
  0x39   : > { %470 = vsyncadd (%p564_p8), %s160_s3, 4294967168  ;;  %p187_p9 = scmp.lt.s32.totalorder %s489_s12, 1  ;;  %v500_v0 = vmov 0   ;;  %v190_v2 = vld [vmem:[%s163_s7] sm:$0xff]  ;;  %s318_s8 = sshll.u32 %s489_s12, 7 }
  0x3a   : > { %384 = vset.pattern.permute.xlu0 %v500_v0  ;;  %s186_s15 = scalar_lea.vmem [#allocation5], %s314_s29  ;;  %s645_s19 = scalar_lea.hbm %s696_s2, %s318_s8 }
  0x3b   : > { %s188_s30 = scalar_select %p187_p9, %s489_s12, 1 }
  0x3c   : > { %s218_s21 = sshll.u32 %s186_s15, 4  ;;  %s204_s20 = scalar_lea.sflag [#allocation4], %s628_s28  ;;  %s647_s21 = int_to_ptr.vmem [resolvable:$true] %s218_s21 }
  0x3d   : > { %s189_s6 = scalar_lea.vmem %s694_s0, %s188_s30  ;;  %s415_s25 = scalar_lea.vmem %s647_s21, 128 }
  0x3e   : > { %v316_v1 = vld [vmem:[%s189_s6] ss:$0 sm:$0xff]  ;;  %p416_p8 = scmp.ne.s32.totalorder %s647_s21, %s415_s25  ;;  %p705_p11 = scmp.ne.s32.totalorder %s700_s22, 0 }
  0x3f   : > { %198 = vperm.xlu0 %384, %v316_v1   ;;  %s501_s12 = smov [#allocation5]  }
  0x40   : > { %p417_p0 = pnand %p416_p8, %p705_p11  ;;  %s419_s26 = sshll.u32 %s501_s12, 4  ;;  %s420_s26 = int_to_ptr.vmem [resolvable:$false] %s419_s26 }
  0x41   : > { %s421_s27 = scalar_lea.vmem %s420_s26, 256  ;;  %p422_p13 = scmp.lt.s32.totalorder %s647_s21, %s420_s26 }
  0x42   : > { %p418_p7 = pneg %p417_p0  ;;  %p423_p3 = scmp.lt.s32.totalorder %s421_s27, %s415_s25 }
  0x44   : > { %p424_p6 = por %p423_p3, %p422_p13 }
  0x46   : > { %p425_p4 = pnand %p424_p6, %p418_p7 }
  0xbe   : > { %v199_v3 = vpop.permute.xlu0 %198 }
  0xbf   : > { %v201_v4 = vmul.f32 %v199_v3, %v190_v2 }
  0xc1   : > { %202 = vst [vmem:[%s186_s15] sm:$0xff] %v201_v4 }
  0xc2   : > { %428 = shalt.err (!%p425_p4)
}
  0xc3   : > { %s429_s28 = scalar_lea.hbm %s645_s19, 128  ;;  %s433_s7 = scalar_lea.hbm %s696_s2, 256 }
  0xc4   : > { %p430_p10 = scmp.ne.s32.totalorder %s645_s19, %s429_s28  ;;  %p434_p2 = scmp.lt.u32.totalorder %s645_s19, %s696_s2 }
  0xc5   : > { %p435_p5 = scmp.lt.u32.totalorder %s433_s7, %s429_s28  ;;  %p437_p8 = scmp.lt.u32.totalorder %s429_s28, %s645_s19 }
  0xc6   : > { %p431_p12 = pnand %p430_p10, %p705_p11 }
  0xc7   : > { %p436_p9 = por %p435_p5, %p434_p2 }
  0xc8   : > { %p432_p1 = pneg %p431_p12 }
  0xc9   : > { %p438_p0 = por %p437_p8, %p436_p9 }
  0xcb   : > { %p439_p7 = pnand %p438_p0, %p432_p1 }
  0xcd   : > { %442 = shalt.err (!%p439_p7)
}
  0xce   : > { %323 = dma.vmem_to_hbm [thread:$0]  (%p705_p11), %s647_s21, 128, %s645_s19, %s204_s20  }
  0xcf PF: > { %s230_s5 = sand.u32 1, %s477_s9   ;;  %p706_p13 = scmp.ne.s32.totalorder %s701_s24, 0 }
  0xd0   : > { %p707_p3 = scmp.ge.s32.totalorder %s497_s14, 2  ;;  %s231_s6 = scalar_lea.sflag [#allocation4], %s230_s5 }
  0xd2   : > { %p330_p6 = pnand %p707_p3, %p706_p13 }
  0xd4   : > { %472 = dma.done.wait (!%p330_p6), %s231_s6, 128  }
  0xd5   : > { %474 = vsyncadd (!%p330_p6), %s231_s6, 4294967168  ;;  %s18_s14 = sadd.s32 1, %s497_s14   ;;  %s708_s9 = smov %s481_s10 }
  0xd6   : > { %p15_p4 = scmp.ge.s32.totalorder %s18_s14, 4   ;;  %s709_s10 = smov %s485_s11 }
  0xd7   : > { %s710_s11 = smov %s573_s23  ;;  %s711_s12 = smov %s493_s13 }
  0xd8   : > { %s712_s13 = smov %s714_s17  ;;  %17 = sbr.rel (!%p15_p4) target bundleno = 6 (0x6), region = 76 }
  0xdf   :  { %236 = vsyncpa [#allocation3], 1 }
  0xe0   :  { %238 = vsyncpa [#allocation3 + $0x1], 1 }
  0xe1   :  { %239 = vsyncpa [#allocation4], 1 }
  0xe2   :  { %241 = vsyncpa [#allocation4 + $0x1], 1 }

</bundles_post_ra>
